<compile_context>
chip_gen: v6e
topology: v6e:2x2x1
jax: 0.10.0
libtpu: 0.0.40
codegen_flags: <defaults>
</compile_context>

<pallas_src>
import functools

import jax
import jax.numpy as jnp
import numpy as np
from jax.experimental import pallas as pl
from jax.experimental.pallas import tpu as pltpu


# ------------------------------ Pallas kernel --------------------------------

def _classify_kernel(x_ref, w_ref, b_ref, o_ref, acc_ref, *, inv_hw):
    """Fused global-avg-pool + 1x1 conv (+bias) + flatten.

    x_ref:   (B, C1, T)    spatial tile (H*W on the lane axis)
    w_ref:   (C1, C2)      1x1 conv weight, stored (Cin, Cout)
    b_ref:   (1, C2)       conv bias
    o_ref:   (B, C2)       flattened output
    acc_ref: (B, C1) f32   running spatial sum (VMEM scratch, grid-resident)
    """
    s = pl.program_id(0)

    @pl.when(s == 0)
    def _():
        acc_ref[...] = jnp.zeros_like(acc_ref)

    # Lane-axis reduction over the spatial tile (XLU); accumulate in f32.
    acc_ref[...] += jnp.sum(x_ref[...].astype(jnp.float32), axis=-1)

    @pl.when(s == pl.num_programs(0) - 1)
    def _():
        pooled = acc_ref[...] * inv_hw                        # (B, C1)
        # acc has C1 on lanes (natural dot-lhs layout); w has C1 on sublanes
        # (natural dot-rhs layout), so no relayout is needed.  Runs once.
        y = jnp.dot(pooled, w_ref[...],
                    preferred_element_type=jnp.float32) + b_ref[...]
        o_ref[...] = y.astype(o_ref.dtype)


# ----------------------------- host-side wrapper -----------------------------

def _spatial_tile(hw, row_bytes, vmem_budget=4 * 1024 * 1024):
    """Largest lane-aligned (multiple-of-128) divisor of hw within budget."""
    cap = max(128, vmem_budget // max(row_bytes, 1))
    best = None
    t = 128
    while t <= hw:
        if hw % t == 0 and t <= cap:
            best = t
        t += 128
    return best if best is not None else hw   # full extent (allowed by Pallas)


def _fused_pool_linear(x_nchw, w_cin_cout, bias):
    B, C1, H, W = x_nchw.shape
    C2 = w_cin_cout.shape[1]
    HW = H * W
    x3 = x_nchw.reshape(B, C1, HW)             # contiguous reshape (free)
    t = _spatial_tile(HW, row_bytes=B * C1 * x3.dtype.itemsize)
    grid = (HW // t,)

    return pl.pallas_call(
        functools.partial(_classify_kernel, inv_hw=1.0 / float(HW)),
        out_shape=jax.ShapeDtypeStruct((B, C2), jnp.float32),
        grid=grid,
        in_specs=[
            pl.BlockSpec((B, C1, t), lambda s: (0, 0, s)),
            pl.BlockSpec((C1, C2), lambda s: (0, 0)),
            pl.BlockSpec((1, C2), lambda s: (0, 0)),
        ],
        out_specs=pl.BlockSpec((B, C2), lambda s: (0, 0)),
        scratch_shapes=[pltpu.VMEM((B, C1), jnp.float32)],
        compiler_params=pltpu.CompilerParams(
            dimension_semantics=("arbitrary",)),   # spatial reduction axis
    )(x3, w_cin_cout, bias.reshape(1, C2))


def classify_forward(x, w_cin_cout, bias):
    """Classify.forward: x is an NCHW array or a list of NCHW arrays."""
    xs = list(x) if isinstance(x, (list, tuple)) else [x]
    # cat_i(pooled_i) @ W  ==  sum_i pooled_i @ W[offset_i : offset_i + Ci]
    out = None
    offset = 0
    for i, xi in enumerate(xs):
        ci = xi.shape[1]
        wi = w_cin_cout[offset:offset + ci, :]
        bi = bias if i == 0 else jnp.zeros_like(bias)
        yi = _fused_pool_linear(xi, wi, bi)
        out = yi if out is None else out + yi
        offset += ci
    return out


# ----------------------------- pure-JAX reference ----------------------------

def reference_forward(x, w_cin_cout, bias):
    xs = list(x) if isinstance(x, (list, tuple)) else [x]
    pooled = jnp.concatenate(
        [jnp.mean(t.astype(jnp.float32), axis=(2, 3)) for t in xs], axis=1)
    return pooled @ w_cin_cout + bias


# ----------------------------------- main -------------------------------------

if __name__ == "__main__":
    key = jax.random.PRNGKey(0)
    kx, kx2, kw, kb = jax.random.split(key, 4)

    B, C1, H, W = 2, 8, 16, 16
    C2 = 16

    x = jax.random.normal(kx, (B, C1, H, W), jnp.float32)
    # Conv2d(c1, c2, 1).weight is (C2, C1, 1, 1) in torch; stored here (C1, C2).
    w = 0.3 * jax.random.normal(kw, (C1, C2), jnp.float32)
    b = 0.1 * jax.random.normal(kb, (C2,), jnp.float32)

    out = jax.block_until_ready(classify_forward(x, w, b))
    ref = reference_forward(x, w, b)
    np.testing.assert_allclose(np.asarray(out), np.asarray(ref),
                               rtol=1e-4, atol=1e-5)

    # list-input path: Classify concatenates pooled features across inputs.
    x2 = jax.random.normal(kx2, (B, C1, H, W), jnp.float32)
    w2 = 0.3 * jax.random.normal(jax.random.fold_in(kw, 1),
                                 (2 * C1, C2), jnp.float32)
    out2 = jax.block_until_ready(classify_forward([x, x2], w2, b))
    ref2 = reference_forward([x, x2], w2, b)
    np.testing.assert_allclose(np.asarray(out2), np.asarray(ref2),
                               rtol=1e-4, atol=1e-5)

    print("KERNEL_OK")
</pallas_src>

<mosaic_0001>
module attributes {stable_mosaic.version = 11 : i64} {
  func.func @_classify_kernel(%arg0: i32, %arg1: memref<2x8x256xf32, #tpu.memory_space<vmem>>, %arg2: memref<8x16xf32, #tpu.memory_space<vmem>>, %arg3: memref<1x16xf32, #tpu.memory_space<vmem>>, %arg4: memref<2x16xf32, #tpu.memory_space<vmem>>, %arg5: memref<2x8xf32, #tpu.memory_space<vmem>>) attributes {dimension_semantics = [#tpu.dimension_semantics<arbitrary>], iteration_bounds = array<i64: 1>, scalar_prefetch = 0 : i64, scratch_operands = 1 : i64, tpu.core_type = #tpu.core_type<tc>, window_params = [{transform_indices = @transform_0, window_bounds = array<i64: 2, 8, 256>}, {pipeline_mode = #tpu.pipeline_mode<synchronous>, transform_indices = @transform_1, window_bounds = array<i64: 8, 16>}, {pipeline_mode = #tpu.pipeline_mode<synchronous>, transform_indices = @transform_2, window_bounds = array<i64: 1, 16>}, {pipeline_mode = #tpu.pipeline_mode<synchronous>, transform_indices = @transform_3, window_bounds = array<i64: 2, 16>}]} {
    %c0_i32 = arith.constant 0 : i32
    %0 = arith.cmpi eq, %arg0, %c0_i32 : i32
    %1 = arith.extui %0 : i1 to i32
    %c0_i32_0 = arith.constant 0 : i32
    %2 = arith.cmpi ne, %1, %c0_i32_0 : i32
    scf.if %2 {
      %cst_9 = arith.constant 0.000000e+00 : f32
      %11 = vector.broadcast %cst_9 : f32 to vector<2x8xf32>
      %c0_10 = arith.constant 0 : index
      %c0_11 = arith.constant 0 : index
      %12 = vector.load %arg5[%c0_10, %c0_11] : memref<2x8xf32, #tpu.memory_space<vmem>>, vector<2x8xf32>
      tpu.vector_store %arg5[%c0_10, %c0_11], %11 {strides = array<i32>} : memref<2x8xf32, #tpu.memory_space<vmem>>, vector<2x8xf32>,
    } else {
    }
    %c0 = arith.constant 0 : index
    %c0_1 = arith.constant 0 : index
    %3 = vector.load %arg5[%c0, %c0_1] : memref<2x8xf32, #tpu.memory_space<vmem>>, vector<2x8xf32>
    %c0_2 = arith.constant 0 : index
    %c0_3 = arith.constant 0 : index
    %c0_4 = arith.constant 0 : index
    %4 = vector.load %arg1[%c0_2, %c0_3, %c0_4] : memref<2x8x256xf32, #tpu.memory_space<vmem>>, vector<2x8x256xf32>
    %cst = arith.constant dense<0.000000e+00> : vector<2x8xf32>
    %5 = vector.multi_reduction <add>, %4, %cst [2] : vector<2x8x256xf32> to vector<2x8xf32>
    %6 = arith.addf %3, %5 : vector<2x8xf32>
    %c0_5 = arith.constant 0 : index
    %c0_6 = arith.constant 0 : index
    %7 = vector.load %arg5[%c0_5, %c0_6] : memref<2x8xf32, #tpu.memory_space<vmem>>, vector<2x8xf32>
    tpu.vector_store %arg5[%c0_5, %c0_6], %6 {strides = array<i32>} : memref<2x8xf32, #tpu.memory_space<vmem>>, vector<2x8xf32>,
    %c0_i32_7 = arith.constant 0 : i32
    %8 = arith.cmpi eq, %arg0, %c0_i32_7 : i32
    %9 = arith.extui %8 : i1 to i32
    %c0_i32_8 = arith.constant 0 : i32
    %10 = arith.cmpi ne, %9, %c0_i32_8 : i32
    scf.if %10 {
      %c0_9 = arith.constant 0 : index
      %c0_10 = arith.constant 0 : index
      %11 = vector.load %arg5[%c0_9, %c0_10] : memref<2x8xf32, #tpu.memory_space<vmem>>, vector<2x8xf32>
      %cst_11 = arith.constant 3.906250e-03 : f32
      %12 = vector.broadcast %cst_11 : f32 to vector<2x8xf32>
      %13 = arith.mulf %11, %12 : vector<2x8xf32>
      %c0_12 = arith.constant 0 : index
      %c0_13 = arith.constant 0 : index
      %14 = vector.load %arg2[%c0_12, %c0_13] : memref<8x16xf32, #tpu.memory_space<vmem>>, vector<8x16xf32>
      %cst_14 = arith.constant dense<0.000000e+00> : vector<2x16xf32>
      %15 = tpu.matmul %13, %14, %cst_14 {dimension_numbers = #tpu.dot_dimension_numbers<[1], [0], [0], [1], [0, 0, 1, 1], [], []>} : vector<2x8xf32>, vector<8x16xf32>, vector<2x16xf32> -> vector<2x16xf32>
      %c0_15 = arith.constant 0 : index
      %c0_16 = arith.constant 0 : index
      %16 = vector.load %arg3[%c0_15, %c0_16] : memref<1x16xf32, #tpu.memory_space<vmem>>, vector<1x16xf32>
      %17 = vector.broadcast %16 : vector<1x16xf32> to vector<2x16xf32>
      %18 = arith.addf %15, %17 : vector<2x16xf32>
      %c0_17 = arith.constant 0 : index
      %c0_18 = arith.constant 0 : index
      %19 = vector.load %arg4[%c0_17, %c0_18] : memref<2x16xf32, #tpu.memory_space<vmem>>, vector<2x16xf32>
      tpu.vector_store %arg4[%c0_17, %c0_18], %18 {strides = array<i32>} : memref<2x16xf32, #tpu.memory_space<vmem>>, vector<2x16xf32>,
    } else {
    }
    return
  }
  func.func @transform_0(%arg0: i32) -> (i32, i32, i32) {
    %c0_i32 = arith.constant 0 : i32
    %c0_i32_0 = arith.constant 0 : i32
    %c0_i32_1 = arith.constant 0 : i32
    return %c0_i32, %c0_i32_0, %arg0 : i32, i32, i32
  }
  func.func @transform_1(%arg0: i32) -> (i32, i32) {
    %c0_i32 = arith.constant 0 : i32
    %c0_i32_0 = arith.constant 0 : i32
    %c0_i32_1 = arith.constant 0 : i32
    return %c0_i32, %c0_i32_0 : i32, i32
  }
  func.func @transform_2(%arg0: i32) -> (i32, i32) {
    %c0_i32 = arith.constant 0 : i32
    %c0_i32_0 = arith.constant 0 : i32
    %c0_i32_1 = arith.constant 0 : i32
    return %c0_i32, %c0_i32_0 : i32, i32
  }
  func.func @transform_3(%arg0: i32) -> (i32, i32) {
    %c0_i32 = arith.constant 0 : i32
    %c0_i32_0 = arith.constant 0 : i32
    %c0_i32_1 = arith.constant 0 : i32
    return %c0_i32, %c0_i32_0 : i32, i32
  }
}

</mosaic_0001>

<bundles_post_ra>
// kernel: tpu_custom_call.1
= control target key start
LH: loop header
LB: loop body
LE: loop exit
PB: predicated region body
PF: predicated region fallthrough
CT: control target
= control target key end

     0   :  { %8 = vsyncpa [#allocation4], 0  ;;  %s304_s0 = inlined_call_operand.hbm [shape: f32[2,8,256], index: 0, kind: input, shape index: {}]   ;;  %s305_s1 = inlined_call_operand.hbm [shape: f32[8,16], index: 1, kind: input, shape index: {}]   ;;  %s306_s2 = inlined_call_operand.vmem [shape: f32[1,16], index: 2, kind: input, shape index: {}]   ;;  %s307_s3 = inlined_call_operand.hbm [shape: f32[2,16], index: 3, kind: output, shape index: {}]  }
   0x1   :  { %9 = vsyncpa [#allocation7], 0 }
   0x2   :  { %10 = vsyncpa [#allocation5], 0  ;;  %s263_s12 = smov [#allocation3]  }
   0x3   :  { %s16_s13 = sshll.u32 %s263_s12, 4  ;;  %s17_s13 = int_to_ptr.vmem [resolvable:$true] %s16_s13 }
   0x4   :  { %s205_s14 = scalar_lea.vmem %s17_s13, 512  ;;  %p210_p1 = scmp.lt.s32.totalorder %s17_s13, %s17_s13 }
   0x5   :  { %p206_p0 = scmp.ne.s32.totalorder %s17_s13, %s205_s14  ;;  %p211_p2 = scmp.lt.s32.totalorder %s205_s14, %s205_s14 }
   0x7   :  { %p212_p3 = por %p211_p2, %p210_p1 }
   0x9   :  { %p213_p4 = pnand %p212_p3, %p206_p0 }
   0xb   :  { %216 = shalt.err (!%p213_p4)
}
   0xc   :  { %s264_s15 = smov 256   ;;  %s265_s16 = smov 16  }
   0xd   :  { %22 = dma.hbm_to_vmem [thread:$0]  %s304_s0, 512, %s17_s13, [#allocation4], %s264_s15, %s264_s15, %s265_s16  }
   0xe   :  { %s266_s19 = smov [#allocation6]  }
   0xf   :  { %s29_s20 = sshll.u32 %s266_s19, 4  ;;  %s30_s20 = int_to_ptr.vmem [resolvable:$true] %s29_s20 }
  0x10   :  { %s225_s21 = scalar_lea.vmem %s30_s20, 128  ;;  %p230_p6 = scmp.lt.s32.totalorder %s30_s20, %s30_s20 }
  0x11   :  { %p226_p5 = scmp.ne.s32.totalorder %s30_s20, %s225_s21  ;;  %p231_p7 = scmp.lt.s32.totalorder %s225_s21, %s225_s21 }
  0x13   :  { %p232_p8 = por %p231_p7, %p230_p6 }
  0x15   :  { %p233_p9 = pnand %p232_p8, %p226_p5 }
  0x17   :  { %236 = shalt.err (!%p233_p9)
}
  0x18   :  { %32 = dma.hbm_to_vmem [thread:$0]  %s305_s1, 128, %s30_s20, [#allocation7]  }
  0x19   :  { %257 = dma.done.wait [#allocation4], 512  }
  0x1a   :  { %258 = vsyncadd [#allocation4], 4294966784 }
  0x1b   :  { %259 = dma.done.wait [#allocation7], 128  }
  0x1c   :  { %260 = vsyncadd [#allocation7], 4294967168  ;;  %v48_v0 = vld [vmem:[#allocation3] sm:$0xff]  ;;  %v49_v1 = vld [vmem:[#allocation3 + $0x8] sm:$0xff]  ;;  %vm45_vm0 = vcmask 58368   ;;  %v267_v6 = vmov 0.0   ;;  %v60_v8 = vlaneseq }
  0x1d   :  { %v50_v2 = vld [vmem:[#allocation3 + $0x10] sm:$0xff]  ;;  %v52_v3 = vadd.f32 %v49_v1, %v48_v0  ;;  %v51_v4 = vld [vmem:[#allocation3 + $0x18] sm:$0xff]  ;;  %46 = vst.msk [vmem:[#allocation2] sm:$0x3] %vm45_vm0, %v267_v6  ;;  %185 = vmatprep.subr.mxu0 %v267_v6  ;;  %v81_v7 = vld [vmem:[#allocation6] sm:$0xff]  ;;  %vm268_vm1 = vmmov 0  }
  0x1e   :  { %v55_v5 = vadd.f32 %v51_v4, %v50_v2  ;;  %186 = vmatpush3.msra.mxu0 %v81_v7  ;;  %187 = vmatprep.mubr.msk.f32.mxu0 %vm268_vm1, %v267_v6  ;;  %v61_v9 = vand.u32 127, %v60_v8  ;;  %v63_v10 = vshrl.u32 %v60_v8, 7  ;;  %vm70_vm2 = vcmask 1041409   ;;  %v181_v21 = vld [vmem:[%s306_s2] ss:$0 sm:$0xff]  ;;  %s269_s24 = smov [#allocation8]  }
  0x1f   :  { %53 = vadd.xlane.f32.xlu0 %v52_v3  ;;  %vm89_vm3 = vcmask 64512   ;;  %s171_s25 = sshll.u32 %s269_s24, 4  ;;  %vm163_vm4 = vcmask 123904   ;;  %s172_s25 = int_to_ptr.vmem [resolvable:$true] %s171_s25 }
  0x20   :  { %v64_v12 = vsub.s32 %v61_v9, %v63_v10  ;;  %s237_s26 = scalar_lea.vmem %s172_s25, 32  ;;  %p242_p11 = scmp.lt.s32.totalorder %s172_s25, %s172_s25 }
  0x21   :  { %p238_p10 = scmp.ne.s32.totalorder %s172_s25, %s237_s26  ;;  %p243_p12 = scmp.lt.s32.totalorder %s237_s26, %s237_s26 }
  0x23   :  { %56 = vadd.xlane.f32.xlu0 %v55_v5  ;;  %p244_p13 = por %p243_p12, %p242_p11 }
  0x24   :  { %v47_v16 = vld [vmem:[#allocation2] sm:$0x3] }
  0x25   :  { %p245_p0 = pnand %p244_p13, %p238_p10 }
  0xa8   :  { %v54_v11 = vpop.xlane.xlu0 %53 }
  0xa9   :  { %v65_v14 = vrot.slane %v54_v11, %v64_v12 }
  0xac   :  { %v57_v13 = vpop.xlane.xlu0 %56 }
  0xad   :  { %v69_v15 = vrot.slane %v57_v13, %v64_v12 }
  0xaf   :  { %v71_v17 = vsel %vm70_vm2, %v69_v15, %v65_v14 }
  0xb0   :  { %v73_v18 = vadd.f32 %v71_v17, %v47_v16 }
  0xb2   :  { %75 = vst.msk [vmem:[#allocation2] sm:$0x3] %vm45_vm0, %v73_v18 }
  0xb9   :  { %v79_v19 = vld [vmem:[#allocation2] sm:$0x3] }
  0xba   :  { %v80_v20 = vmul.f32 0.00390625, %v79_v19 }
  0xbc   :  { %188 = vmatmul.mubr.msk.f32.vlgmr.msra.gmra.mxu0 %vm89_vm3, %v80_v20 }
 0x17c   :  { %v159_v22 = vpop.f32.mrf.mxu0 }
 0x17d   :  { %v160_v23 = vadd.f32 %v181_v21, %v159_v22 }
 0x17e   :  { %v189_v24 = vpop.f32.mrf.mxu0 }
 0x17f   :  { %164 = vst.msk [vmem:[#allocation8] sm:$0x3] %vm163_vm4, %v160_v23 }
 0x180   :  { %248 = shalt.err (!%p245_p0)
}
 0x181   :  { %174 = dma.vmem_to_hbm [thread:$0]  %s172_s25, 32, %s307_s3, [#allocation5]  }
 0x182   :  { %261 = dma.done.wait [#allocation5], 32  }
 0x183   :  { %262 = vsyncadd [#allocation5], 4294967264 }
 0x184   :  { %178 = vsyncpa [#allocation4], 1 }
 0x185   :  { %179 = vsyncpa [#allocation7], 1 }
 0x186   :  { %180 = vsyncpa [#allocation5], 1 }

</bundles_post_ra>
